<compile_context>
chip_gen: v7x
topology: tpu7x:2x2x1
jax: 0.10.0
libtpu: 0.0.40
codegen_flags: <defaults>
</compile_context>

<pallas_src>
import functools

import jax
import jax.numpy as jnp
from jax.experimental import pallas as pl
from jax.experimental.pallas import tpu as pltpu


def _ffn_kernel(xc_ref, xp_ref,
                w1c_ref, b1c_ref, w1p_ref, b1p_ref,
                w2c_ref, b2c_ref, w2p_ref, b2p_ref,
                gc_ref, gp_ref, bc_ref, bp_ref,
                oc_ref, op_ref, *, d_hid, eps):
    """One (tile_n, :) tile of tokens: partitioned FFN + residual + LayerNorm."""
    xc = xc_ref[...].astype(jnp.float32)          # (TN, d_content), residual stays f32
    xp = xp_ref[...].astype(jnp.float32)          # (TN, d_positional)
    mm = w1c_ref.dtype                            # bf16 by default -> native MXU path

    # Content partition: relu(xc @ W1c + b1c) @ W2c + b2c  (f32 accumulation).
    hc = jnp.dot(xc.astype(mm), w1c_ref[...],
                 preferred_element_type=jnp.float32) + b1c_ref[...]
    hc = jnp.maximum(hc, 0.0)
    rc = xc + jnp.dot(hc.astype(mm), w2c_ref[...],
                      preferred_element_type=jnp.float32) + b2c_ref[...]

    # Positional partition.
    hp = jnp.dot(xp.astype(mm), w1p_ref[...],
                 preferred_element_type=jnp.float32) + b1p_ref[...]
    hp = jnp.maximum(hp, 0.0)
    rp = xp + jnp.dot(hp.astype(mm), w2p_ref[...],
                      preferred_element_type=jnp.float32) + b2p_ref[...]

    # HPSG LayerNormalization over the full d_hid row, computed from per-partition
    # partial sums (unbiased d_hid-1 variance, eps added to sigma — matches torch.std).
    mu = (jnp.sum(rc, axis=-1, keepdims=True) +
          jnp.sum(rp, axis=-1, keepdims=True)) * (1.0 / d_hid)
    dc = rc - mu
    dp = rp - mu
    ssq = (jnp.sum(dc * dc, axis=-1, keepdims=True) +
           jnp.sum(dp * dp, axis=-1, keepdims=True))
    sigma = jnp.sqrt(ssq * (1.0 / (d_hid - 1)))
    inv = 1.0 / (sigma + eps)                     # exact divide; hides under the MXU

    oc_ref[...] = (dc * inv * gc_ref[...] + bc_ref[...]).astype(oc_ref.dtype)
    op_ref[...] = (dp * inv * gp_ref[...] + bp_ref[...]).astype(op_ref.dtype)


def prepare_params(params, d_content, weights_dtype=jnp.bfloat16):
    """One-time (per layer) weight prep: transposes, dtype casts, bias/LN splits.

    Call once and reuse across forward calls — do NOT rebuild per step.
    """
    wd = weights_dtype
    f32 = jnp.float32
    return {
        "w1c": params["w_1c"].T.astype(wd),                     # (d_content, dff2)
        "b1c": params["b_1c"].reshape(1, -1).astype(f32),
        "w1p": params["w_1p"].T.astype(wd),                     # (d_positional, dff2)
        "b1p": params["b_1p"].reshape(1, -1).astype(f32),
        "w2c": params["w_2c"].T.astype(wd),                     # (dff2, d_content)
        "b2c": params["b_2c"].reshape(1, -1).astype(f32),
        "w2p": params["w_2p"].T.astype(wd),                     # (dff2, d_positional)
        "b2p": params["b_2p"].reshape(1, -1).astype(f32),
        "gamma_c": params["ln_a"][:d_content].reshape(1, -1).astype(f32),
        "gamma_p": params["ln_a"][d_content:].reshape(1, -1).astype(f32),
        "beta_c": params["ln_b"][:d_content].reshape(1, -1).astype(f32),
        "beta_p": params["ln_b"][d_content:].reshape(1, -1).astype(f32),
    }


def partitioned_ffn(x, prepared, d_content, *, tile_n=None, eps=1e-3,
                    vmem_limit_bytes=None, single_buffer_weights=True):
    """x: [N, d_hid] float32.  prepared: output of prepare_params."""
    N, d_hid = x.shape
    d_positional = d_hid - d_content
    dff2 = prepared["w1c"].shape[1]
    assert prepared["w1c"].shape == (d_content, dff2)
    assert prepared["w1p"].shape == (d_positional, dff2)

    # Per-chip sizing: v5e/v6e have 128 MiB VMEM per core, v7x 64 MiB per TC.
    try:
        vmem_cap = pltpu.get_tpu_info().vmem_capacity_bytes
    except Exception:
        vmem_cap = 64 * 1024 * 1024
    if vmem_limit_bytes is None:
        vmem_limit_bytes = min(int(vmem_cap * 3 // 4), 96 * 1024 * 1024)
    if tile_n is None:
        tile_n = 512 if vmem_cap > 96 * 1024 * 1024 else 256   # 512 on v5e/v6e, 256 on v7x

    # Guarantee >= 2 grid steps when N is small (both v7x TCs get work, less padding
    # waste); keep tile_n a multiple of 8 (sublane).
    if N < 2 * tile_n:
        tile_n = max(8, (((N + 1) // 2) + 7) // 8 * 8)

    pad = (-N) % tile_n
    x_pad = jnp.pad(x, ((0, pad), (0, 0))) if pad else x
    n_pad = N + pad
    xc = x_pad[:, :d_content]          # XLA-side slices; kernel never lane-slices
    xp = x_pad[:, d_content:]

    kernel = functools.partial(_ffn_kernel, d_hid=d_hid, eps=eps)
    weight_args = (prepared["w1c"], prepared["b1c"], prepared["w1p"], prepared["b1p"],
                   prepared["w2c"], prepared["b2c"], prepared["w2p"], prepared["b2p"],
                   prepared["gamma_c"], prepared["gamma_p"],
                   prepared["beta_c"], prepared["beta_p"])

    def _run(weight_pipeline_mode):
        def _const(arr):
            # Grid-invariant (constant index map): DMA'd once, reused every step.
            if weight_pipeline_mode is None:
                return pl.BlockSpec(arr.shape, lambda i: (0, 0))
            return pl.BlockSpec(arr.shape, lambda i: (0, 0),
                                pipeline_mode=weight_pipeline_mode)

        grid_spec = pltpu.PrefetchScalarGridSpec(
            num_scalar_prefetch=0,
            grid=(n_pad // tile_n,),
            in_specs=[pl.BlockSpec((tile_n, d_content), lambda i: (i, 0)),
                      pl.BlockSpec((tile_n, d_positional), lambda i: (i, 0))]
                     + [_const(a) for a in weight_args],
            out_specs=[pl.BlockSpec((tile_n, d_content), lambda i: (i, 0)),
                       pl.BlockSpec((tile_n, d_positional), lambda i: (i, 0))],
        )
        return pl.pallas_call(
            kernel,
            out_shape=(jax.ShapeDtypeStruct((n_pad, d_content), x.dtype),
                       jax.ShapeDtypeStruct((n_pad, d_positional), x.dtype)),
            grid_spec=grid_spec,
            compiler_params=pltpu.CompilerParams(
                dimension_semantics=("parallel",),      # megacore / v7x 2-TC sharding
                vmem_limit_bytes=vmem_limit_bytes),
        )(xc, xp, *weight_args)

    if single_buffer_weights:
        try:
            out_c, out_p = _run(pl.Buffered(1))   # halve resident weight footprint
        except Exception:
            out_c, out_p = _run(None)             # fallback: default double-buffering
    else:
        out_c, out_p = _run(None)

    out = jnp.concatenate([out_c, out_p], axis=-1)
    return out[:N] if pad else out


def init_params(key, d_hid, d_ff, d_positional):
    d_content = d_hid - d_positional
    dff2 = d_ff // 2
    ks = jax.random.split(key, 8)
    s = 0.02
    return {
        "w_1c": s * jax.random.normal(ks[0], (dff2, d_content), jnp.float32),
        "b_1c": s * jax.random.normal(ks[1], (dff2,), jnp.float32),
        "w_1p": s * jax.random.normal(ks[2], (dff2, d_positional), jnp.float32),
        "b_1p": s * jax.random.normal(ks[3], (dff2,), jnp.float32),
        "w_2c": s * jax.random.normal(ks[4], (d_content, dff2), jnp.float32),
        "b_2c": s * jax.random.normal(ks[5], (d_content,), jnp.float32),
        "w_2p": s * jax.random.normal(ks[6], (d_positional, dff2), jnp.float32),
        "b_2p": s * jax.random.normal(ks[7], (d_positional,), jnp.float32),
        "ln_a": jnp.ones((d_hid,), jnp.float32),
        "ln_b": jnp.zeros((d_hid,), jnp.float32),
    }


def _reference(x, params, d_content, eps=1e-3):
    """Pure-JAX reference mirroring the PyTorch forward (eval mode)."""
    xc, xp = x[:, :d_content], x[:, d_content:]
    hc = jnp.maximum(xc @ params["w_1c"].T + params["b_1c"], 0.0)
    oc = hc @ params["w_2c"].T + params["b_2c"]
    hp = jnp.maximum(xp @ params["w_1p"].T + params["b_1p"], 0.0)
    op = hp @ params["w_2p"].T + params["b_2p"]
    out = jnp.concatenate([oc, op], axis=-1) + x
    mu = jnp.mean(out, axis=-1, keepdims=True)
    sigma = jnp.sqrt(jnp.sum((out - mu) ** 2, axis=-1, keepdims=True) / (x.shape[-1] - 1))
    ln = (out - mu) / (sigma + eps)
    return ln * params["ln_a"] + params["ln_b"]


if __name__ == "__main__":
    # Small shapes: d_hid=32 (content 24 + positional 8), d_ff=64, batch=2, seq=8.
    d_hid, d_ff, d_positional = 32, 64, 8
    d_content = d_hid - d_positional
    batch, seq = 2, 8
    N = batch * seq

    key = jax.random.PRNGKey(0)
    kx, kp = jax.random.split(key)
    x = jax.random.normal(kx, (N, d_hid), jnp.float32)
    params = init_params(kp, d_hid, d_ff, d_positional)
    # batch_idxs only matters for (disabled) FeatureDropout; not needed in eval mode.

    ref = _reference(x, params, d_content)

    # f32 weight path: tight parity check (exact-divide LayerNorm).
    prep32 = prepare_params(params, d_content, weights_dtype=jnp.float32)
    out32 = jax.block_until_ready(partitioned_ffn(x, prep32, d_content))
    assert out32.shape == (N, d_hid)
    assert jnp.allclose(out32, ref, atol=2e-3, rtol=2e-3), "f32 mismatch vs reference"

    # bf16 weight/MXU-input path (production default): f32 accumulation + f32 LN,
    # so only the (small) FFN delta carries bf16 rounding.
    prep16 = prepare_params(params, d_content)   # weights_dtype=jnp.bfloat16
    out16 = jax.block_until_ready(partitioned_ffn(x, prep16, d_content))
    assert out16.shape == (N, d_hid)
    assert jnp.allclose(out16, ref, atol=1e-2, rtol=1e-2), "bf16 mismatch vs reference"

    print("KERNEL_OK")
</pallas_src>

<mosaic_0001>
module attributes {stable_mosaic.version = 11 : i64} {
  func.func @_ffn_kernel(%arg0: i32, %arg1: memref<8x24xf32, #tpu.memory_space<vmem>>, %arg2: memref<8x8xf32, #tpu.memory_space<vmem>>, %arg3: memref<24x32xf32, #tpu.memory_space<vmem>>, %arg4: memref<1x32xf32, #tpu.memory_space<vmem>>, %arg5: memref<8x32xf32, #tpu.memory_space<vmem>>, %arg6: memref<1x32xf32, #tpu.memory_space<vmem>>, %arg7: memref<32x24xf32, #tpu.memory_space<vmem>>, %arg8: memref<1x24xf32, #tpu.memory_space<vmem>>, %arg9: memref<32x8xf32, #tpu.memory_space<vmem>>, %arg10: memref<1x8xf32, #tpu.memory_space<vmem>>, %arg11: memref<1x24xf32, #tpu.memory_space<vmem>>, %arg12: memref<1x8xf32, #tpu.memory_space<vmem>>, %arg13: memref<1x24xf32, #tpu.memory_space<vmem>>, %arg14: memref<1x8xf32, #tpu.memory_space<vmem>>, %arg15: memref<8x24xf32, #tpu.memory_space<vmem>>, %arg16: memref<8x8xf32, #tpu.memory_space<vmem>>) attributes {dimension_semantics = [#tpu.dimension_semantics<parallel>], iteration_bounds = array<i64: 2>, scalar_prefetch = 0 : i64, scratch_operands = 0 : i64, tpu.core_type = #tpu.core_type<tc>, window_params = [{transform_indices = @transform_0, window_bounds = array<i64: 8, 24>}, {transform_indices = @transform_1, window_bounds = array<i64: 8, 8>}, {pipeline_mode = #tpu.pipeline_mode<synchronous>, transform_indices = @transform_2, window_bounds = array<i64: 24, 32>}, {pipeline_mode = #tpu.pipeline_mode<synchronous>, transform_indices = @transform_3, window_bounds = array<i64: 1, 32>}, {pipeline_mode = #tpu.pipeline_mode<synchronous>, transform_indices = @transform_4, window_bounds = array<i64: 8, 32>}, {pipeline_mode = #tpu.pipeline_mode<synchronous>, transform_indices = @transform_5, window_bounds = array<i64: 1, 32>}, {pipeline_mode = #tpu.pipeline_mode<synchronous>, transform_indices = @transform_6, window_bounds = array<i64: 32, 24>}, {pipeline_mode = #tpu.pipeline_mode<synchronous>, transform_indices = @transform_7, window_bounds = array<i64: 1, 24>}, {pipeline_mode = #tpu.pipeline_mode<synchronous>, transform_indices = @transform_8, window_bounds = array<i64: 32, 8>}, {pipeline_mode = #tpu.pipeline_mode<synchronous>, transform_indices = @transform_9, window_bounds = array<i64: 1, 8>}, {pipeline_mode = #tpu.pipeline_mode<synchronous>, transform_indices = @transform_10, window_bounds = array<i64: 1, 24>}, {pipeline_mode = #tpu.pipeline_mode<synchronous>, transform_indices = @transform_11, window_bounds = array<i64: 1, 8>}, {pipeline_mode = #tpu.pipeline_mode<synchronous>, transform_indices = @transform_12, window_bounds = array<i64: 1, 24>}, {pipeline_mode = #tpu.pipeline_mode<synchronous>, transform_indices = @transform_13, window_bounds = array<i64: 1, 8>}, {transform_indices = @transform_14, window_bounds = array<i64: 8, 24>}, {transform_indices = @transform_15, window_bounds = array<i64: 8, 8>}]} {
    %c0 = arith.constant 0 : index
    %c0_0 = arith.constant 0 : index
    %0 = vector.load %arg1[%c0, %c0_0] : memref<8x24xf32, #tpu.memory_space<vmem>>, vector<8x24xf32>
    %c0_1 = arith.constant 0 : index
    %c0_2 = arith.constant 0 : index
    %1 = vector.load %arg2[%c0_1, %c0_2] : memref<8x8xf32, #tpu.memory_space<vmem>>, vector<8x8xf32>
    %c0_3 = arith.constant 0 : index
    %c0_4 = arith.constant 0 : index
    %2 = vector.load %arg3[%c0_3, %c0_4] : memref<24x32xf32, #tpu.memory_space<vmem>>, vector<24x32xf32>
    %cst = arith.constant dense<0.000000e+00> : vector<8x32xf32>
    %3 = tpu.matmul %0, %2, %cst {dimension_numbers = #tpu.dot_dimension_numbers<[1], [0], [0], [1], [0, 0, 1, 1], [], []>} : vector<8x24xf32>, vector<24x32xf32>, vector<8x32xf32> -> vector<8x32xf32>
    %c0_5 = arith.constant 0 : index
    %c0_6 = arith.constant 0 : index
    %4 = vector.load %arg4[%c0_5, %c0_6] : memref<1x32xf32, #tpu.memory_space<vmem>>, vector<1x32xf32>
    %5 = vector.broadcast %4 : vector<1x32xf32> to vector<8x32xf32>
    %6 = arith.addf %3, %5 : vector<8x32xf32>
    %cst_7 = arith.constant 0.000000e+00 : f32
    %7 = vector.broadcast %cst_7 : f32 to vector<8x32xf32>
    %8 = arith.maximumf %6, %7 : vector<8x32xf32>
    %c0_8 = arith.constant 0 : index
    %c0_9 = arith.constant 0 : index
    %9 = vector.load %arg7[%c0_8, %c0_9] : memref<32x24xf32, #tpu.memory_space<vmem>>, vector<32x24xf32>
    %cst_10 = arith.constant dense<0.000000e+00> : vector<8x24xf32>
    %10 = tpu.matmul %8, %9, %cst_10 {dimension_numbers = #tpu.dot_dimension_numbers<[1], [0], [0], [1], [0, 0, 1, 1], [], []>} : vector<8x32xf32>, vector<32x24xf32>, vector<8x24xf32> -> vector<8x24xf32>
    %11 = arith.addf %0, %10 : vector<8x24xf32>
    %c0_11 = arith.constant 0 : index
    %c0_12 = arith.constant 0 : index
    %12 = vector.load %arg8[%c0_11, %c0_12] : memref<1x24xf32, #tpu.memory_space<vmem>>, vector<1x24xf32>
    %13 = vector.broadcast %12 : vector<1x24xf32> to vector<8x24xf32>
    %14 = arith.addf %11, %13 : vector<8x24xf32>
    %c0_13 = arith.constant 0 : index
    %c0_14 = arith.constant 0 : index
    %15 = vector.load %arg5[%c0_13, %c0_14] : memref<8x32xf32, #tpu.memory_space<vmem>>, vector<8x32xf32>
    %cst_15 = arith.constant dense<0.000000e+00> : vector<8x32xf32>
    %16 = tpu.matmul %1, %15, %cst_15 {dimension_numbers = #tpu.dot_dimension_numbers<[1], [0], [0], [1], [0, 0, 1, 1], [], []>} : vector<8x8xf32>, vector<8x32xf32>, vector<8x32xf32> -> vector<8x32xf32>
    %c0_16 = arith.constant 0 : index
    %c0_17 = arith.constant 0 : index
    %17 = vector.load %arg6[%c0_16, %c0_17] : memref<1x32xf32, #tpu.memory_space<vmem>>, vector<1x32xf32>
    %18 = vector.broadcast %17 : vector<1x32xf32> to vector<8x32xf32>
    %19 = arith.addf %16, %18 : vector<8x32xf32>
    %cst_18 = arith.constant 0.000000e+00 : f32
    %20 = vector.broadcast %cst_18 : f32 to vector<8x32xf32>
    %21 = arith.maximumf %19, %20 : vector<8x32xf32>
    %c0_19 = arith.constant 0 : index
    %c0_20 = arith.constant 0 : index
    %22 = vector.load %arg9[%c0_19, %c0_20] : memref<32x8xf32, #tpu.memory_space<vmem>>, vector<32x8xf32>
    %cst_21 = arith.constant dense<0.000000e+00> : vector<8x8xf32>
    %23 = tpu.matmul %21, %22, %cst_21 {dimension_numbers = #tpu.dot_dimension_numbers<[1], [0], [0], [1], [0, 0, 1, 1], [], []>} : vector<8x32xf32>, vector<32x8xf32>, vector<8x8xf32> -> vector<8x8xf32>
    %24 = arith.addf %1, %23 : vector<8x8xf32>
    %c0_22 = arith.constant 0 : index
    %c0_23 = arith.constant 0 : index
    %25 = vector.load %arg10[%c0_22, %c0_23] : memref<1x8xf32, #tpu.memory_space<vmem>>, vector<1x8xf32>
    %26 = vector.broadcast %25 : vector<1x8xf32> to vector<8x8xf32>
    %27 = arith.addf %24, %26 : vector<8x8xf32>
    %cst_24 = arith.constant dense<0.000000e+00> : vector<8xf32>
    %28 = vector.multi_reduction <add>, %14, %cst_24 [1] : vector<8x24xf32> to vector<8xf32>
    %29 = vector.shape_cast %28 : vector<8xf32> to vector<8x1xf32>
    %cst_25 = arith.constant dense<0.000000e+00> : vector<8xf32>
    %30 = vector.multi_reduction <add>, %27, %cst_25 [1] : vector<8x8xf32> to vector<8xf32>
    %31 = vector.shape_cast %30 : vector<8xf32> to vector<8x1xf32>
    %32 = arith.addf %29, %31 : vector<8x1xf32>
    %cst_26 = arith.constant 3.125000e-02 : f32
    %33 = vector.broadcast %cst_26 : f32 to vector<8x1xf32>
    %34 = arith.mulf %32, %33 : vector<8x1xf32>
    %35 = vector.broadcast %34 : vector<8x1xf32> to vector<8x24xf32>
    %36 = arith.subf %14, %35 : vector<8x24xf32>
    %37 = vector.broadcast %34 : vector<8x1xf32> to vector<8x8xf32>
    %38 = arith.subf %27, %37 : vector<8x8xf32>
    %39 = arith.mulf %36, %36 : vector<8x24xf32>
    %cst_27 = arith.constant dense<0.000000e+00> : vector<8xf32>
    %40 = vector.multi_reduction <add>, %39, %cst_27 [1] : vector<8x24xf32> to vector<8xf32>
    %41 = vector.shape_cast %40 : vector<8xf32> to vector<8x1xf32>
    %42 = arith.mulf %38, %38 : vector<8x8xf32>
    %cst_28 = arith.constant dense<0.000000e+00> : vector<8xf32>
    %43 = vector.multi_reduction <add>, %42, %cst_28 [1] : vector<8x8xf32> to vector<8xf32>
    %44 = vector.shape_cast %43 : vector<8xf32> to vector<8x1xf32>
    %45 = arith.addf %41, %44 : vector<8x1xf32>
    %cst_29 = arith.constant 0.0322580636 : f32
    %46 = vector.broadcast %cst_29 : f32 to vector<8x1xf32>
    %47 = arith.mulf %45, %46 : vector<8x1xf32>
    %48 = math.sqrt %47 : vector<8x1xf32>
    %cst_30 = arith.constant 1.000000e-03 : f32
    %49 = vector.broadcast %cst_30 : f32 to vector<8x1xf32>
    %50 = arith.addf %48, %49 : vector<8x1xf32>
    %cst_31 = arith.constant 1.000000e+00 : f32
    %51 = vector.broadcast %cst_31 : f32 to vector<8x1xf32>
    %52 = arith.divf %51, %50 : vector<8x1xf32>
    %53 = vector.broadcast %52 : vector<8x1xf32> to vector<8x24xf32>
    %54 = arith.mulf %36, %53 : vector<8x24xf32>
    %c0_32 = arith.constant 0 : index
    %c0_33 = arith.constant 0 : index
    %55 = vector.load %arg11[%c0_32, %c0_33] : memref<1x24xf32, #tpu.memory_space<vmem>>, vector<1x24xf32>
    %56 = vector.broadcast %55 : vector<1x24xf32> to vector<8x24xf32>
    %57 = arith.mulf %54, %56 : vector<8x24xf32>
    %c0_34 = arith.constant 0 : index
    %c0_35 = arith.constant 0 : index
    %58 = vector.load %arg13[%c0_34, %c0_35] : memref<1x24xf32, #tpu.memory_space<vmem>>, vector<1x24xf32>
    %59 = vector.broadcast %58 : vector<1x24xf32> to vector<8x24xf32>
    %60 = arith.addf %57, %59 : vector<8x24xf32>
    %c0_36 = arith.constant 0 : index
    %c0_37 = arith.constant 0 : index
    %61 = vector.load %arg15[%c0_36, %c0_37] : memref<8x24xf32, #tpu.memory_space<vmem>>, vector<8x24xf32>
    tpu.vector_store %arg15[%c0_36, %c0_37], %60 {strides = array<i32>} : memref<8x24xf32, #tpu.memory_space<vmem>>, vector<8x24xf32>,
    %62 = vector.broadcast %52 : vector<8x1xf32> to vector<8x8xf32>
    %63 = arith.mulf %38, %62 : vector<8x8xf32>
    %c0_38 = arith.constant 0 : index
    %c0_39 = arith.constant 0 : index
    %64 = vector.load %arg12[%c0_38, %c0_39] : memref<1x8xf32, #tpu.memory_space<vmem>>, vector<1x8xf32>
    %65 = vector.broadcast %64 : vector<1x8xf32> to vector<8x8xf32>
    %66 = arith.mulf %63, %65 : vector<8x8xf32>
    %c0_40 = arith.constant 0 : index
    %c0_41 = arith.constant 0 : index
    %67 = vector.load %arg14[%c0_40, %c0_41] : memref<1x8xf32, #tpu.memory_space<vmem>>, vector<1x8xf32>
    %68 = vector.broadcast %67 : vector<1x8xf32> to vector<8x8xf32>
    %69 = arith.addf %66, %68 : vector<8x8xf32>
    %c0_42 = arith.constant 0 : index
    %c0_43 = arith.constant 0 : index
    %70 = vector.load %arg16[%c0_42, %c0_43] : memref<8x8xf32, #tpu.memory_space<vmem>>, vector<8x8xf32>
    tpu.vector_store %arg16[%c0_42, %c0_43], %69 {strides = array<i32>} : memref<8x8xf32, #tpu.memory_space<vmem>>, vector<8x8xf32>,
    return
  }
  func.func @transform_0(%arg0: i32) -> (i32, i32) {
    %c0_i32 = arith.constant 0 : i32
    %c0_i32_0 = arith.constant 0 : i32
    return %arg0, %c0_i32 : i32, i32
  }
  func.func @transform_1(%arg0: i32) -> (i32, i32) {
    %c0_i32 = arith.constant 0 : i32
    %c0_i32_0 = arith.constant 0 : i32
    return %arg0, %c0_i32 : i32, i32
  }
  func.func @transform_2(%arg0: i32) -> (i32, i32) {
    %c0_i32 = arith.constant 0 : i32
    %c0_i32_0 = arith.constant 0 : i32
    %c0_i32_1 = arith.constant 0 : i32
    return %c0_i32, %c0_i32_0 : i32, i32
  }
  func.func @transform_3(%arg0: i32) -> (i32, i32) {
    %c0_i32 = arith.constant 0 : i32
    %c0_i32_0 = arith.constant 0 : i32
    %c0_i32_1 = arith.constant 0 : i32
    return %c0_i32, %c0_i32_0 : i32, i32
  }
  func.func @transform_4(%arg0: i32) -> (i32, i32) {
    %c0_i32 = arith.constant 0 : i32
    %c0_i32_0 = arith.constant 0 : i32
    %c0_i32_1 = arith.constant 0 : i32
    return %c0_i32, %c0_i32_0 : i32, i32
  }
  func.func @transform_5(%arg0: i32) -> (i32, i32) {
    %c0_i32 = arith.constant 0 : i32
    %c0_i32_0 = arith.constant 0 : i32
    %c0_i32_1 = arith.constant 0 : i32
    return %c0_i32, %c0_i32_0 : i32, i32
  }
  func.func @transform_6(%arg0: i32) -> (i32, i32) {
    %c0_i32 = arith.constant 0 : i32
    %c0_i32_0 = arith.constant 0 : i32
    %c0_i32_1 = arith.constant 0 : i32
    return %c0_i32, %c0_i32_0 : i32, i32
  }
  func.func @transform_7(%arg0: i32) -> (i32, i32) {
    %c0_i32 = arith.constant 0 : i32
    %c0_i32_0 = arith.constant 0 : i32
    %c0_i32_1 = arith.constant 0 : i32
    return %c0_i32, %c0_i32_0 : i32, i32
  }
  func.func @transform_8(%arg0: i32) -> (i32, i32) {
    %c0_i32 = arith.constant 0 : i32
    %c0_i32_0 = arith.constant 0 : i32
    %c0_i32_1 = arith.constant 0 : i32
    return %c0_i32, %c0_i32_0 : i32, i32
  }
  func.func @transform_9(%arg0: i32) -> (i32, i32) {
    %c0_i32 = arith.constant 0 : i32
    %c0_i32_0 = arith.constant 0 : i32
    %c0_i32_1 = arith.constant 0 : i32
    return %c0_i32, %c0_i32_0 : i32, i32
  }
  func.func @transform_10(%arg0: i32) -> (i32, i32) {
    %c0_i32 = arith.constant 0 : i32
    %c0_i32_0 = arith.constant 0 : i32
    %c0_i32_1 = arith.constant 0 : i32
    return %c0_i32, %c0_i32_0 : i32, i32
  }
  func.func @transform_11(%arg0: i32) -> (i32, i32) {
    %c0_i32 = arith.constant 0 : i32
    %c0_i32_0 = arith.constant 0 : i32
    %c0_i32_1 = arith.constant 0 : i32
    return %c0_i32, %c0_i32_0 : i32, i32
  }
  func.func @transform_12(%arg0: i32) -> (i32, i32) {
    %c0_i32 = arith.constant 0 : i32
    %c0_i32_0 = arith.constant 0 : i32
    %c0_i32_1 = arith.constant 0 : i32
    return %c0_i32, %c0_i32_0 : i32, i32
  }
  func.func @transform_13(%arg0: i32) -> (i32, i32) {
    %c0_i32 = arith.constant 0 : i32
    %c0_i32_0 = arith.constant 0 : i32
    %c0_i32_1 = arith.constant 0 : i32
    return %c0_i32, %c0_i32_0 : i32, i32
  }
  func.func @transform_14(%arg0: i32) -> (i32, i32) {
    %c0_i32 = arith.constant 0 : i32
    %c0_i32_0 = arith.constant 0 : i32
    return %arg0, %c0_i32 : i32, i32
  }
  func.func @transform_15(%arg0: i32) -> (i32, i32) {
    %c0_i32 = arith.constant 0 : i32
    %c0_i32_0 = arith.constant 0 : i32
    return %arg0, %c0_i32 : i32, i32
  }
}

module attributes {stable_mosaic.version = 11 : i64} {
  func.func @_ffn_kernel(%arg0: i32, %arg1: memref<8x24xf32, #tpu.memory_space<vmem>>, %arg2: memref<8x8xf32, #tpu.memory_space<vmem>>, %arg3: memref<24x32xf32, #tpu.memory_space<vmem>>, %arg4: memref<1x32xf32, #tpu.memory_space<vmem>>, %arg5: memref<8x32xf32, #tpu.memory_space<vmem>>, %arg6: memref<1x32xf32, #tpu.memory_space<vmem>>, %arg7: memref<32x24xf32, #tpu.memory_space<vmem>>, %arg8: memref<1x24xf32, #tpu.memory_space<vmem>>, %arg9: memref<32x8xf32, #tpu.memory_space<vmem>>, %arg10: memref<1x8xf32, #tpu.memory_space<vmem>>, %arg11: memref<1x24xf32, #tpu.memory_space<vmem>>, %arg12: memref<1x8xf32, #tpu.memory_space<vmem>>, %arg13: memref<1x24xf32, #tpu.memory_space<vmem>>, %arg14: memref<1x8xf32, #tpu.memory_space<vmem>>, %arg15: memref<8x24xf32, #tpu.memory_space<vmem>>, %arg16: memref<8x8xf32, #tpu.memory_space<vmem>>) attributes {dimension_semantics = [#tpu.dimension_semantics<parallel>], iteration_bounds = array<i64: 2>, scalar_prefetch = 0 : i64, scratch_operands = 0 : i64, tpu.core_type = #tpu.core_type<tc>, window_params = [{transform_indices = @transform_0, window_bounds = array<i64: 8, 24>}, {transform_indices = @transform_1, window_bounds = array<i64: 8, 8>}, {pipeline_mode = #tpu.pipeline_mode<synchronous>, transform_indices = @transform_2, window_bounds = array<i64: 24, 32>}, {pipeline_mode = #tpu.pipeline_mode<synchronous>, transform_indices = @transform_3, window_bounds = array<i64: 1, 32>}, {pipeline_mode = #tpu.pipeline_mode<synchronous>, transform_indices = @transform_4, window_bounds = array<i64: 8, 32>}, {pipeline_mode = #tpu.pipeline_mode<synchronous>, transform_indices = @transform_5, window_bounds = array<i64: 1, 32>}, {pipeline_mode = #tpu.pipeline_mode<synchronous>, transform_indices = @transform_6, window_bounds = array<i64: 32, 24>}, {pipeline_mode = #tpu.pipeline_mode<synchronous>, transform_indices = @transform_7, window_bounds = array<i64: 1, 24>}, {pipeline_mode = #tpu.pipeline_mode<synchronous>, transform_indices = @transform_8, window_bounds = array<i64: 32, 8>}, {pipeline_mode = #tpu.pipeline_mode<synchronous>, transform_indices = @transform_9, window_bounds = array<i64: 1, 8>}, {pipeline_mode = #tpu.pipeline_mode<synchronous>, transform_indices = @transform_10, window_bounds = array<i64: 1, 24>}, {pipeline_mode = #tpu.pipeline_mode<synchronous>, transform_indices = @transform_11, window_bounds = array<i64: 1, 8>}, {pipeline_mode = #tpu.pipeline_mode<synchronous>, transform_indices = @transform_12, window_bounds = array<i64: 1, 24>}, {pipeline_mode = #tpu.pipeline_mode<synchronous>, transform_indices = @transform_13, window_bounds = array<i64: 1, 8>}, {transform_indices = @transform_14, window_bounds = array<i64: 8, 24>}, {transform_indices = @transform_15, window_bounds = array<i64: 8, 8>}]} {
    %c0 = arith.constant 0 : index
    %c0_0 = arith.constant 0 : index
    %0 = vector.load %arg1[%c0, %c0_0] : memref<8x24xf32, #tpu.memory_space<vmem>>, vector<8x24xf32>
    %c0_1 = arith.constant 0 : index
    %c0_2 = arith.constant 0 : index
    %1 = vector.load %arg2[%c0_1, %c0_2] : memref<8x8xf32, #tpu.memory_space<vmem>>, vector<8x8xf32>
    %c0_3 = arith.constant 0 : index
    %c0_4 = arith.constant 0 : index
    %2 = vector.load %arg3[%c0_3, %c0_4] : memref<24x32xf32, #tpu.memory_space<vmem>>, vector<24x32xf32>
    %cst = arith.constant dense<0.000000e+00> : vector<8x32xf32>
    %3 = tpu.matmul %0, %2, %cst {dimension_numbers = #tpu.dot_dimension_numbers<[1], [0], [0], [1], [0, 0, 1, 1], [], []>} : vector<8x24xf32>, vector<24x32xf32>, vector<8x32xf32> -> vector<8x32xf32>
    %c0_5 = arith.constant 0 : index
    %c0_6 = arith.constant 0 : index
    %4 = vector.load %arg4[%c0_5, %c0_6] : memref<1x32xf32, #tpu.memory_space<vmem>>, vector<1x32xf32>
    %5 = vector.broadcast %4 : vector<1x32xf32> to vector<8x32xf32>
    %6 = arith.addf %3, %5 : vector<8x32xf32>
    %cst_7 = arith.constant 0.000000e+00 : f32
    %7 = vector.broadcast %cst_7 : f32 to vector<8x32xf32>
    %8 = arith.maximumf %6, %7 : vector<8x32xf32>
    %c0_8 = arith.constant 0 : index
    %c0_9 = arith.constant 0 : index
    %9 = vector.load %arg7[%c0_8, %c0_9] : memref<32x24xf32, #tpu.memory_space<vmem>>, vector<32x24xf32>
    %cst_10 = arith.constant dense<0.000000e+00> : vector<8x24xf32>
    %10 = tpu.matmul %8, %9, %cst_10 {dimension_numbers = #tpu.dot_dimension_numbers<[1], [0], [0], [1], [0, 0, 1, 1], [], []>} : vector<8x32xf32>, vector<32x24xf32>, vector<8x24xf32> -> vector<8x24xf32>
    %11 = arith.addf %0, %10 : vector<8x24xf32>
    %c0_11 = arith.constant 0 : index
    %c0_12 = arith.constant 0 : index
    %12 = vector.load %arg8[%c0_11, %c0_12] : memref<1x24xf32, #tpu.memory_space<vmem>>, vector<1x24xf32>
    %13 = vector.broadcast %12 : vector<1x24xf32> to vector<8x24xf32>
    %14 = arith.addf %11, %13 : vector<8x24xf32>
    %c0_13 = arith.constant 0 : index
    %c0_14 = arith.constant 0 : index
    %15 = vector.load %arg5[%c0_13, %c0_14] : memref<8x32xf32, #tpu.memory_space<vmem>>, vector<8x32xf32>
    %cst_15 = arith.constant dense<0.000000e+00> : vector<8x32xf32>
    %16 = tpu.matmul %1, %15, %cst_15 {dimension_numbers = #tpu.dot_dimension_numbers<[1], [0], [0], [1], [0, 0, 1, 1], [], []>} : vector<8x8xf32>, vector<8x32xf32>, vector<8x32xf32> -> vector<8x32xf32>
    %c0_16 = arith.constant 0 : index
    %c0_17 = arith.constant 0 : index
    %17 = vector.load %arg6[%c0_16, %c0_17] : memref<1x32xf32, #tpu.memory_space<vmem>>, vector<1x32xf32>
    %18 = vector.broadcast %17 : vector<1x32xf32> to vector<8x32xf32>
    %19 = arith.addf %16, %18 : vector<8x32xf32>
    %cst_18 = arith.constant 0.000000e+00 : f32
    %20 = vector.broadcast %cst_18 : f32 to vector<8x32xf32>
    %21 = arith.maximumf %19, %20 : vector<8x32xf32>
    %c0_19 = arith.constant 0 : index
    %c0_20 = arith.constant 0 : index
    %22 = vector.load %arg9[%c0_19, %c0_20] : memref<32x8xf32, #tpu.memory_space<vmem>>, vector<32x8xf32>
    %cst_21 = arith.constant dense<0.000000e+00> : vector<8x8xf32>
    %23 = tpu.matmul %21, %22, %cst_21 {dimension_numbers = #tpu.dot_dimension_numbers<[1], [0], [0], [1], [0, 0, 1, 1], [], []>} : vector<8x32xf32>, vector<32x8xf32>, vector<8x8xf32> -> vector<8x8xf32>
    %24 = arith.addf %1, %23 : vector<8x8xf32>
    %c0_22 = arith.constant 0 : index
    %c0_23 = arith.constant 0 : index
    %25 = vector.load %arg10[%c0_22, %c0_23] : memref<1x8xf32, #tpu.memory_space<vmem>>, vector<1x8xf32>
    %26 = vector.broadcast %25 : vector<1x8xf32> to vector<8x8xf32>
    %27 = arith.addf %24, %26 : vector<8x8xf32>
    %cst_24 = arith.constant dense<0.000000e+00> : vector<8xf32>
    %28 = vector.multi_reduction <add>, %14, %cst_24 [1] : vector<8x24xf32> to vector<8xf32>
    %29 = vector.shape_cast %28 : vector<8xf32> to vector<8x1xf32>
    %cst_25 = arith.constant dense<0.000000e+00> : vector<8xf32>
    %30 = vector.multi_reduction <add>, %27, %cst_25 [1] : vector<8x8xf32> to vector<8xf32>
    %31 = vector.shape_cast %30 : vector<8xf32> to vector<8x1xf32>
    %32 = arith.addf %29, %31 : vector<8x1xf32>
    %cst_26 = arith.constant 3.125000e-02 : f32
    %33 = vector.broadcast %cst_26 : f32 to vector<8x1xf32>
    %34 = arith.mulf %32, %33 : vector<8x1xf32>
    %35 = vector.broadcast %34 : vector<8x1xf32> to vector<8x24xf32>
    %36 = arith.subf %14, %35 : vector<8x24xf32>
    %37 = vector.broadcast %34 : vector<8x1xf32> to vector<8x8xf32>
    %38 = arith.subf %27, %37 : vector<8x8xf32>
    %39 = arith.mulf %36, %36 : vector<8x24xf32>
    %cst_27 = arith.constant dense<0.000000e+00> : vector<8xf32>
    %40 = vector.multi_reduction <add>, %39, %cst_27 [1] : vector<8x24xf32> to vector<8xf32>
    %41 = vector.shape_cast %40 : vector<8xf32> to vector<8x1xf32>
    %42 = arith.mulf %38, %38 : vector<8x8xf32>
    %cst_28 = arith.constant dense<0.000000e+00> : vector<8xf32>
    %43 = vector.multi_reduction <add>, %42, %cst_28 [1] : vector<8x8xf32> to vector<8xf32>
    %44 = vector.shape_cast %43 : vector<8xf32> to vector<8x1xf32>
    %45 = arith.addf %41, %44 : vector<8x1xf32>
    %cst_29 = arith.constant 0.0322580636 : f32
    %46 = vector.broadcast %cst_29 : f32 to vector<8x1xf32>
    %47 = arith.mulf %45, %46 : vector<8x1xf32>
    %48 = math.sqrt %47 : vector<8x1xf32>
    %cst_30 = arith.constant 1.000000e-03 : f32
    %49 = vector.broadcast %cst_30 : f32 to vector<8x1xf32>
    %50 = arith.addf %48, %49 : vector<8x1xf32>
    %cst_31 = arith.constant 1.000000e+00 : f32
    %51 = vector.broadcast %cst_31 : f32 to vector<8x1xf32>
    %52 = arith.divf %51, %50 : vector<8x1xf32>
    %53 = vector.broadcast %52 : vector<8x1xf32> to vector<8x24xf32>
    %54 = arith.mulf %36, %53 : vector<8x24xf32>
    %c0_32 = arith.constant 0 : index
    %c0_33 = arith.constant 0 : index
    %55 = vector.load %arg11[%c0_32, %c0_33] : memref<1x24xf32, #tpu.memory_space<vmem>>, vector<1x24xf32>
    %56 = vector.broadcast %55 : vector<1x24xf32> to vector<8x24xf32>
    %57 = arith.mulf %54, %56 : vector<8x24xf32>
    %c0_34 = arith.constant 0 : index
    %c0_35 = arith.constant 0 : index
    %58 = vector.load %arg13[%c0_34, %c0_35] : memref<1x24xf32, #tpu.memory_space<vmem>>, vector<1x24xf32>
    %59 = vector.broadcast %58 : vector<1x24xf32> to vector<8x24xf32>
    %60 = arith.addf %57, %59 : vector<8x24xf32>
    %c0_36 = arith.constant 0 : index
    %c0_37 = arith.constant 0 : index
    %61 = vector.load %arg15[%c0_36, %c0_37] : memref<8x24xf32, #tpu.memory_space<vmem>>, vector<8x24xf32>
    tpu.vector_store %arg15[%c0_36, %c0_37], %60 {strides = array<i32>} : memref<8x24xf32, #tpu.memory_space<vmem>>, vector<8x24xf32>,
    %62 = vector.broadcast %52 : vector<8x1xf32> to vector<8x8xf32>
    %63 = arith.mulf %38, %62 : vector<8x8xf32>
    %c0_38 = arith.constant 0 : index
    %c0_39 = arith.constant 0 : index
    %64 = vector.load %arg12[%c0_38, %c0_39] : memref<1x8xf32, #tpu.memory_space<vmem>>, vector<1x8xf32>
    %65 = vector.broadcast %64 : vector<1x8xf32> to vector<8x8xf32>
    %66 = arith.mulf %63, %65 : vector<8x8xf32>
    %c0_40 = arith.constant 0 : index
    %c0_41 = arith.constant 0 : index
    %67 = vector.load %arg14[%c0_40, %c0_41] : memref<1x8xf32, #tpu.memory_space<vmem>>, vector<1x8xf32>
    %68 = vector.broadcast %67 : vector<1x8xf32> to vector<8x8xf32>
    %69 = arith.addf %66, %68 : vector<8x8xf32>
    %c0_42 = arith.constant 0 : index
    %c0_43 = arith.constant 0 : index
    %70 = vector.load %arg16[%c0_42, %c0_43] : memref<8x8xf32, #tpu.memory_space<vmem>>, vector<8x8xf32>
    tpu.vector_store %arg16[%c0_42, %c0_43], %69 {strides = array<i32>} : memref<8x8xf32, #tpu.memory_space<vmem>>, vector<8x8xf32>,
    return
  }
  func.func @transform_0(%arg0: i32) -> (i32, i32) {
    %c0_i32 = arith.constant 0 : i32
    %c0_i32_0 = arith.constant 0 : i32
    return %arg0, %c0_i32 : i32, i32
  }
  func.func @transform_1(%arg0: i32) -> (i32, i32) {
    %c0_i32 = arith.constant 0 : i32
    %c0_i32_0 = arith.constant 0 : i32
    return %arg0, %c0_i32 : i32, i32
  }
  func.func @transform_2(%arg0: i32) -> (i32, i32) {
    %c0_i32 = arith.constant 0 : i32
    %c0_i32_0 = arith.constant 0 : i32
    %c0_i32_1 = arith.constant 0 : i32
    return %c0_i32, %c0_i32_0 : i32, i32
  }
  func.func @transform_3(%arg0: i32) -> (i32, i32) {
    %c0_i32 = arith.constant 0 : i32
    %c0_i32_0 = arith.constant 0 : i32
    %c0_i32_1 = arith.constant 0 : i32
    return %c0_i32, %c0_i32_0 : i32, i32
  }
  func.func @transform_4(%arg0: i32) -> (i32, i32) {
    %c0_i32 = arith.constant 0 : i32
    %c0_i32_0 = arith.constant 0 : i32
    %c0_i32_1 = arith.constant 0 : i32
    return %c0_i32, %c0_i32_0 : i32, i32
  }
  func.func @transform_5(%arg0: i32) -> (i32, i32) {
    %c0_i32 = arith.constant 0 : i32
    %c0_i32_0 = arith.constant 0 : i32
    %c0_i32_1 = arith.constant 0 : i32
    return %c0_i32, %c0_i32_0 : i32, i32
  }
  func.func @transform_6(%arg0: i32) -> (i32, i32) {
    %c0_i32 = arith.constant 0 : i32
    %c0_i32_0 = arith.constant 0 : i32
    %c0_i32_1 = arith.constant 0 : i32
    return %c0_i32, %c0_i32_0 : i32, i32
  }
  func.func @transform_7(%arg0: i32) -> (i32, i32) {
    %c0_i32 = arith.constant 0 : i32
    %c0_i32_0 = arith.constant 0 : i32
    %c0_i32_1 = arith.constant 0 : i32
    return %c0_i32, %c0_i32_0 : i32, i32
  }
  func.func @transform_8(%arg0: i32) -> (i32, i32) {
    %c0_i32 = arith.constant 0 : i32
    %c0_i32_0 = arith.constant 0 : i32
    %c0_i32_1 = arith.constant 0 : i32
    return %c0_i32, %c0_i32_0 : i32, i32
  }
  func.func @transform_9(%arg0: i32) -> (i32, i32) {
    %c0_i32 = arith.constant 0 : i32
    %c0_i32_0 = arith.constant 0 : i32
    %c0_i32_1 = arith.constant 0 : i32
    return %c0_i32, %c0_i32_0 : i32, i32
  }
  func.func @transform_10(%arg0: i32) -> (i32, i32) {
    %c0_i32 = arith.constant 0 : i32
    %c0_i32_0 = arith.constant 0 : i32
    %c0_i32_1 = arith.constant 0 : i32
    return %c0_i32, %c0_i32_0 : i32, i32
  }
  func.func @transform_11(%arg0: i32) -> (i32, i32) {
    %c0_i32 = arith.constant 0 : i32
    %c0_i32_0 = arith.constant 0 : i32
    %c0_i32_1 = arith.constant 0 : i32
    return %c0_i32, %c0_i32_0 : i32, i32
  }
  func.func @transform_12(%arg0: i32) -> (i32, i32) {
    %c0_i32 = arith.constant 0 : i32
    %c0_i32_0 = arith.constant 0 : i32
    %c0_i32_1 = arith.constant 0 : i32
    return %c0_i32, %c0_i32_0 : i32, i32
  }
  func.func @transform_13(%arg0: i32) -> (i32, i32) {
    %c0_i32 = arith.constant 0 : i32
    %c0_i32_0 = arith.constant 0 : i32
    %c0_i32_1 = arith.constant 0 : i32
    return %c0_i32, %c0_i32_0 : i32, i32
  }
  func.func @transform_14(%arg0: i32) -> (i32, i32) {
    %c0_i32 = arith.constant 0 : i32
    %c0_i32_0 = arith.constant 0 : i32
    return %arg0, %c0_i32 : i32, i32
  }
  func.func @transform_15(%arg0: i32) -> (i32, i32) {
    %c0_i32 = arith.constant 0 : i32
    %c0_i32_0 = arith.constant 0 : i32
    return %arg0, %c0_i32 : i32, i32
  }
}

</mosaic_0001>

<bundles_post_ra>
// kernel: tpu_custom_call.1
= control target key start
LH: loop header
LB: loop body
LE: loop exit
PB: predicated region body
PF: predicated region fallthrough
CT: control target
= control target key end

     0   :  { %s1513_s0 = inlined_call_operand.vmem [shape: f32[16,24], index: 0, kind: input, shape index: {}]   ;;  %s1514_s1 = inlined_call_operand.vmem [shape: f32[16,8], index: 1, kind: input, shape index: {}]   ;;  %s1515_s2 = inlined_call_operand.vmem [shape: f32[24,32], index: 2, kind: input, shape index: {}]   ;;  %s1516_s3 = inlined_call_operand.vmem [shape: f32[1,32], index: 3, kind: input, shape index: {}]   ;;  %s1517_s4 = inlined_call_operand.vmem [shape: f32[8,32], index: 4, kind: input, shape index: {}]   ;;  %s1518_s5 = inlined_call_operand.vmem [shape: f32[1,32], index: 5, kind: input, shape index: {}]   ;;  %s1519_s6 = inlined_call_operand.vmem [shape: f32[32,24], index: 6, kind: input, shape index: {}]   ;;  %s1520_s7 = inlined_call_operand.vmem [shape: f32[1,24], index: 7, kind: input, shape index: {}]   ;;  %s1521_s8 = inlined_call_operand.vmem [shape: f32[32,8], index: 8, kind: input, shape index: {}]   ;;  %s1522_s9 = inlined_call_operand.vmem [shape: f32[1,8], index: 9, kind: input, shape index: {}]   ;;  %s1523_s10 = inlined_call_operand.vmem [shape: f32[1,24], index: 10, kind: input, shape index: {}]   ;;  %s1524_s11 = inlined_call_operand.vmem [shape: f32[1,8], index: 11, kind: input, shape index: {}]   ;;  %s1525_s12 = inlined_call_operand.vmem [shape: f32[1,24], index: 12, kind: input, shape index: {}]   ;;  %s1526_s13 = inlined_call_operand.vmem [shape: f32[1,8], index: 13, kind: input, shape index: {}]   ;;  %s1527_s14 = inlined_call_operand.hbm [shape: f32[16,24], index: 14, kind: output, shape index: {0}]   ;;  %s1528_s15 = inlined_call_operand.vmem [shape: f32[16,8], index: 15, kind: output, shape index: {1}]  }
   0x1   :  { %1533 = sst [smem:[#allocation9_spill]] %s1513_s0 }
   0x2   :  { %1534 = sst [smem:[#allocation10_spill]] %s1514_s1 }
   0x3   :  { %1535 = sst [smem:[#allocation11_spill]] %s1515_s2 }
   0x4   :  { %1536 = sst [smem:[#allocation12_spill]] %s1516_s3 }
   0x5   :  { %1537 = sst [smem:[#allocation13_spill]] %s1517_s4 }
   0x6   :  { %21 = vsyncpa [#allocation3], 0 }
   0x7   :  { %23 = vsyncpa [#allocation3 + $0x1], 0  ;;  %s1328_s18 = smov 0   ;;  %s1330_s19 = smov 0  }
   0x8   :  { %s1332_s20 = smov 0   ;;  %s1334_s21 = smov 0  }
   0x9 LB: > { %1538 = sst [smem:[#allocation5_spill]] %s1238_s20  ;;  %s1349_s22 = sadd.s32 4294967295, %s1242_s21   ;;  %s1242_s21 = sphi %s1334_s21, %s1550_s21   ;;  %s1238_s20 = sphi %s1332_s20, %s1552_s20   ;;  %s1234_s19 = sphi %s1330_s19, %s1554_s19   ;;  %s1230_s18 = sphi %s1328_s18, %s1553_s18  }
   0xa   : > { %s1043_s23 = sadd.s32 4294967294, %s1242_s21   ;;  %s1353_s24 = sadd.s32 1, %s1242_s21  }
   0xb   : > { %1539 = sst [smem:[#allocation6_spill]] %s1353_s24  ;;  %s340_s25 = sadd.s32 1, %s1238_s20 }
   0xc   : > { %s337_s26 = ssub.s32 %s1242_s21, %s1353_s24  ;;  %p350_p0 = scmp.ne.s32.totalorder %s1238_s20, %s1234_s19 }
   0xd   : > { %p338_p1 = scmp.eq.s32.totalorder %s337_s26, 0  ;;  %p351_p2 = scmp.eq.s32.totalorder %s1349_s22, 1 }
   0xe   : > { %p356_p3 = scmp.ne.s32.totalorder %s1234_s19, %s1230_s18  ;;  %p357_p4 = scmp.eq.s32.totalorder %s1043_s23, 1 }
   0xf   : > { %s1364_s27 = scalar_select %p338_p1, %s1238_s20, %s340_s25  }
  0x10   : > { %p1366_p5 = por %p351_p2, %p350_p0  ;;  %p1370_p6 = por %p357_p4, %p356_p3 }
  0x11   : > { %1540 = sst [smem:[#allocation7_spill]] %s1364_s27  ;;  %p1046_p7 = scmp.ge.s32.totalorder %s1242_s21, 1 }
  0x12   : > { %s1542_s29 = scalar_select %p1370_p6, 1, 0 }
  0x13   : > { %p451_p8 = scmp.lt.s32.totalorder %s1242_s21, 3 }
  0x14   : > { %1543 = sst [smem:[#allocation8_spill]] %s1542_s29 }
  0x15   : > { %p452_p9 = pnand %p1046_p7, %p451_p8 }
  0x16   : > { %s1544_s2 = sld [smem:[#allocation11_spill]] (!%p452_p9)  ;;  %v1244_v2 = vmov (!%p452_p9), 0.0|0.0   ;;  %vm1245_vm0 = vmmov (!%p452_p9), 0   ;;  %v1246_v4 = vmov (!%p452_p9), 0.0   ;;  %p506_p10 = scmp.lt.s32.totalorder (!%p452_p9), %s1349_s22, 1  ;;  %v605_v5 = vld [vmem:[%s1519_s6] sm:$0xff] (!%p452_p9) }
  0x17   : > { %455 = sbr.rel (%p452_p9) target bundleno = 827 (0x33b), region = 76  ;;  %1119 = vmatprep.subr.bf16.mxu0 (!%p452_p9), %v1244_v2  ;;  %1089 = vmatprep.mubr.msk.f32.mxu0 (!%p452_p9), %vm1245_vm0, %v1246_v4  ;;  %v606_v6 = vld [vmem:[%s1519_s6 + $0x8] sm:$0xff] (!%p452_p9)  ;;  %vm530_vm1 = vcmask (!%p452_p9), 195584   ;;  %s1545_s0 = sld [smem:[#allocation9_spill]] (!%p452_p9)  ;;  %vm700_vm2 = vcmask (!%p452_p9), 64512   ;;  %v607_v12 = vld [vmem:[%s1519_s6 + $0x10] sm:$0xff] (!%p452_p9) }
  0x18   : > { %1122 = vmatprep.subr.bf16.mxu1 (!%p452_p9), %v1244_v2  ;;  %v1123_v7 = vpack.c.bf16 (!%p452_p9), %v606_v6, %v605_v5  ;;  %1100 = vmatprep.mubr.msk.f32.mxu1 (!%p452_p9), %vm1245_vm0, %v1246_v4  ;;  %s1546_s4 = sld [smem:[#allocation13_spill]] (!%p452_p9)  ;;  %s1547_s1 = sld [smem:[#allocation10_spill]] (!%p452_p9)  ;;  %v608_v13 = vld [vmem:[%s1519_s6 + $0x18] sm:$0xff] (!%p452_p9)  ;;  %v775_v16 = vld [vmem:[%s1521_s8] sm:$0xff] (!%p452_p9)  ;;  %v776_v17 = vld [vmem:[%s1521_s8 + $0x8] sm:$0xff] (!%p452_p9)  ;;  %vm609_vm3 = vcmask (!%p452_p9), 261120  }
  0x19   : > { %v1126_v14 = vpack.c.bf16 (!%p452_p9), %v608_v13, %v607_v12  ;;  %s1548_s3 = sld [smem:[#allocation12_spill]] (!%p452_p9)  ;;  %v1129_v21 = vpack.c.bf16 (!%p452_p9), %v776_v17, %v775_v16  ;;  %v1055_v22 = vld [vmem:[%s1518_s5] ss:$0 sm:$0xff] (!%p452_p9)  ;;  %v777_v24 = vld [vmem:[%s1521_s8 + $0x10] sm:$0xff] (!%p452_p9)  ;;  %v778_v25 = vld [vmem:[%s1521_s8 + $0x18] sm:$0xff] (!%p452_p9) }
  0x1a   : > { %1124 = vmatpush3.bf16.msra.mxu1 (!%p452_p9), %v1123_v7  ;;  %v1132_v29 = vpack.c.bf16 (!%p452_p9), %v778_v25, %v777_v24  ;;  %v1054_v32 = vld [vmem:[%s1520_s7] ss:$0 sm:$0xff] (!%p452_p9) }
  0x1b   : > { %1125 = vmatprep.subr.bf16.mxu1 (!%p452_p9), %v1244_v2  ;;  %v1058_v38 = vld [vmem:[%s1522_s9] ss:$0 sm:$0xff] (!%p452_p9) }
  0x1c   : > { %v520_v0 = vld [vmem:[%s1544_s2] sm:$0xff] (!%p452_p9)  ;;  %v521_v1 = vld [vmem:[%s1544_s2 + $0x8] sm:$0xff] (!%p452_p9)  ;;  %v522_v8 = vld [vmem:[%s1544_s2 + $0x10] sm:$0xff] (!%p452_p9) }
  0x1d   : > { %v1120_v3 = vpack.c.bf16 (!%p452_p9), %v521_v1, %v520_v0  ;;  %v1061_v0 = vld [vmem:[%s1524_s11] ss:$0 sm:$0xff] (!%p452_p9) }
  0x1e   : > { %s507_s17 = scalar_select %p506_p10, %s1349_s22, 1  ;;  %v692_v9 = vld [vmem:[%s1546_s4] sm:$0xff]  ;;  %1127 = vmatpush3.bf16.msra.mxu1 %v1126_v14 }
  0x1f   : > { %1121 = vmatpush3.bf16.msra.mxu0 %v1120_v3  ;;  %1128 = vmatprep.subr.bf16.mxu1 %v1244_v2  ;;  %v1051_v15 = vld [vmem:[%s1548_s3] ss:$0 sm:$0xff] }
  0x20   : > { %1087 = vmatprep.subr.mxu0 %v1246_v4  ;;  %s1395_s20 = sshll.u32 %s507_s17, 3  ;;  %s497_s17 = sand.u32 1, %s1234_s19   ;;  %v1059_v1 = vld [vmem:[%s1523_s10] ss:$0 sm:$0xff] }
  0x21   : > { %s509_s30 = scalar_lea.vmem %s1545_s0, %s1395_s20  ;;  %s513_s23 = scalar_lea.vmem %s1547_s1, %s1395_s20  ;;  %v1060_v5 = vld [vmem:[%s1525_s12] ss:$0 sm:$0xff] }
  0x22   : > { %v518_v10 = vld [vmem:[%s509_s30] sm:$0xff]  ;;  %s1047_s25 = sshll.u32 %s497_s17, 3  ;;  %s1064_s1 = sshll.u32 %s1349_s22, 7 }
  0x23   : > { %1088 = vmatpush3.msra.mxu0 %v522_v8  ;;  %v519_v11 = vld [vmem:[%s513_s23] sm:$0xff]  ;;  %s499_s2 = scalar_lea.vmem [#allocation2], %s1047_s25  ;;  %s517_s29 = scalar_lea.vmem %s1528_s15, %s1395_s20 }
  0x24   : > { %1090 = vmatmul.mubr.msk.f32.vlgmr.msra.gmra.mrb[0].mxu0 %vm530_vm1, %v518_v10  ;;  %1103 = vmatprep.subr.mxu0 %v1246_v4  ;;  %s945_s3 = sshll.u32 %s499_s2, 4  ;;  %s1469_s0 = scalar_lea.hbm %s1527_s14, %s1064_s1  ;;  %s1471_s3 = int_to_ptr.vmem [resolvable:$true] %s945_s3 }
  0x25   : > { %1104 = vmatpush3.msra.mxu0 %v692_v9  ;;  %1105 = vmatprep.mubr.msk.f32.mxu0 %vm1245_vm0, %v1246_v4  ;;  %s928_s22 = scalar_lea.sflag [#allocation3], %s497_s17  ;;  %s1180_s25 = scalar_lea.vmem %s1471_s3, 128 }
  0x26   : > { %p1181_p11 = scmp.ne.s32.totalorder %s1471_s3, %s1180_s25  ;;  %s1247_s20 = smov [#allocation2]  }
  0x27   : > { %s1184_s16 = sshll.u32 %s1247_s20, 4  ;;  %s1185_s16 = int_to_ptr.vmem [resolvable:$false] %s1184_s16 }
  0x28   : > { %1106 = vmatmul.mubr.msk.f32.vlgmr.msra.gmra.mrb[2].mxu0 %vm700_vm2, %v519_v11  ;;  %p1182_p12 = pnand %p1181_p11, %p1366_p5  ;;  %s1186_s1 = scalar_lea.vmem %s1185_s16, 256 }
  0x29   : > { %p1187_p0 = scmp.lt.s32.totalorder %s1471_s3, %s1185_s16  ;;  %p1188_p1 = scmp.lt.s32.totalorder %s1186_s1, %s1180_s25 }
  0x2a   : > { %p1183_p13 = pneg %p1182_p12 }
  0x2b   : > { %p1189_p2 = por %p1188_p1, %p1187_p0 }
  0x2d   : > { %p1190_p3 = pnand %p1189_p2, %p1183_p13 }
  0xf7   : > { %v600_v18 = vpop.f32.mrb[0].mxu0 }
  0xf8   : > { %v601_v19 = vadd.f32 %v1051_v15, %v600_v18  ;;  %v1091_v20 = vpop.f32.mrb[1].mxu0 }
  0xfa   : > { %v604_v23 = vmax.f32 %v601_v19, 0.0 }
  0xfb   : > { %v770_v26 = vpop.f32.mrb[2].mxu0 }
  0xfc   : > { %1101 = vmatmul.mubr.msk.f32.vlgmr.msra.gmra.mrb[0].mxu1 %vm609_vm3, %v604_v23  ;;  %v771_v27 = vadd.f32 %v1055_v22, %v770_v26  ;;  %v1107_v28 = vpop.f32.mrb[3].mxu0 }
  0xfd   : > { %1130 = vmatpush3.bf16.msra.mxu1 %v1129_v21  ;;  %1116 = vmatprep.mubr.msk.f32.mxu1 %vm1245_vm0, %v1246_v4  ;;  %v1062_v4 = vld [vmem:[%s1526_s13] ss:$0 sm:$0xff] }
  0xfe   : > { %1131 = vmatprep.subr.bf16.mxu1 %v1244_v2  ;;  %v774_v30 = vmax.f32 %v771_v27, 0.0 }
 0x101   : > { %1133 = vmatpush3.bf16.msra.mxu1 %v1132_v29 }
 0x104   : > { %1117 = vmatmul.mubr.msk.f32.vlgmr.msra.gmra.mrb[2].mxu1 %vm609_vm3, %v774_v30 }
 0x1cf   : > { %v679_v31 = vpop.f32.mrb[0].mxu1 }
 0x1d0   : > { %v683_v33 = vadd.f32 %v679_v31, %v518_v10  ;;  %v1102_v34 = vpop.f32.mrb[1].mxu1 }
 0x1d2   : > { %v691_v35 = vadd.f32 %v1054_v32, %v683_v33 }
 0x1d4   : > { %v861_v36 = vsel %vm530_vm1, %v691_v35, 0.0 }
 0x1d5   : > { %862 = vadd.xlane.f32.xlu0 %v861_v36 }
 0x1d7   : > { %v848_v37 = vpop.f32.mrb[2].mxu1 }
 0x1d8   : > { %v852_v39 = vadd.f32 %v848_v37, %v519_v11  ;;  %v1118_v40 = vpop.f32.mrb[3].mxu1 }
 0x1da   : > { %v860_v41 = vadd.f32 %v1058_v38, %v852_v39 }
 0x1dc   : > { %v864_v42 = vsel %vm700_vm2, %v860_v41, 0.0 }
 0x1dd   : > { %865 = vadd.xlane.f32.xlu0 %v864_v42 }
 0x262   : > { %v863_v43 = vpop.xlane.xlu0 %862 }
 0x26a   : > { %v866_v44 = vpop.xlane.xlu0 %865 }
 0x26b   : > { %v867_v45 = vadd.f32 %v866_v44, %v863_v43 }
 0x26d   : > { %v868_v46 = vmul.f32 0.03125, %v867_v45 }
 0x26f   : > { %v869_v47 = vsub.f32 %v691_v35, %v868_v46  ;;  %v870_v48 = vsub.f32 %v860_v41, %v868_v46 }
 0x271   : > { %v871_v49 = vmul.f32 %v869_v47, %v869_v47  ;;  %v875_v51 = vmul.f32 %v870_v48, %v870_v48 }
 0x273   : > { %v872_v50 = vsel %vm530_vm1, %v871_v49, 0.0  ;;  %v876_v52 = vsel %vm700_vm2, %v875_v51, 0.0 }
 0x274   : > { %873 = vadd.xlane.f32.xlu1 %v872_v50 }
 0x278   : > { %877 = vadd.xlane.f32.xlu1 %v876_v52 }
 0x301   : > { %v874_v53 = vpop.xlane.xlu1 %873 }
 0x305   : > { %v878_v54 = vpop.xlane.xlu1 %877 }
 0x306   : > { %v879_v55 = vadd.f32 %v878_v54, %v874_v53 }
 0x308   : > { %v880_v56 = vmul.f32 0.032258064, %v879_v55 }
 0x30a   : > { %1176 = vrsqrt.f32 %v880_v56  ;;  %vm883_vm4 = vcmp.eq.f32.partialorder %v880_v56, inf  ;;  %v886_v59 = vand.u32 2147483648, %v880_v56  ;;  %vm885_vm5 = vcmp.eq.f32.partialorder %v880_v56, 0.0 }
 0x314   : > { %v1177_v57 = vpop.eup %1176 }
 0x315   : > { %v882_v58 = vmul.f32 %v1177_v57, %v880_v56 }
 0x317   : > { %v884_v60 = vsel %vm883_vm4, %v880_v56, %v882_v58 }
 0x318   : > { %v887_v61 = vsel %vm885_vm5, %v886_v59, %v884_v60 }
 0x319   : > { %v888_v62 = vadd.f32 0.001, %v887_v61 }
 0x31b   : > { %1178 = vrcp.f32 %v888_v62 }
 0x325   : > { %v1179_v63 = vpop.eup %1178 }
 0x326   : > { %v909_v2 = vmul.f32 %v1179_v63, %v870_v48  ;;  %v891_v3 = vmul.f32 %v1179_v63, %v869_v47 }
 0x328   : > { %v917_v6 = vmul.f32 %v1061_v0, %v909_v2  ;;  %v899_v7 = vmul.f32 %v1059_v1, %v891_v3 }
 0x32a   : > { %v925_v8 = vadd.f32 %v1062_v4, %v917_v6  ;;  %v907_v9 = vadd.f32 %v1060_v5, %v899_v7 }
 0x32c   : > { %926 = vst.msk [vmem:[%s517_s29] sm:$0xff] %vm700_vm2, %v925_v8 }
 0x32d   : > { %908 = vst.msk [vmem:[%s499_s2] sm:$0xff] %vm530_vm1, %v907_v9 }
 0x32e   : > { %1193 = shalt.err (!%p1190_p3)
}
 0x32f   : > { %s1194_s2 = scalar_lea.hbm %s1469_s0, 128  ;;  %s1198_s27 = scalar_lea.hbm %s1527_s14, 256 }
 0x330   : > { %p1195_p4 = scmp.ne.s32.totalorder %s1469_s0, %s1194_s2  ;;  %p1199_p9 = scmp.lt.u32.totalorder %s1469_s0, %s1527_s14 }
 0x331   : > { %p1200_p10 = scmp.lt.u32.totalorder %s1198_s27, %s1194_s2  ;;  %p1202_p12 = scmp.lt.u32.totalorder %s1194_s2, %s1469_s0 }
 0x332   : > { %p1196_p7 = pnand %p1195_p4, %p1366_p5 }
 0x333   : > { %p1201_p11 = por %p1200_p10, %p1199_p9 }
 0x334   : > { %p1197_p8 = pneg %p1196_p7 }
 0x335   : > { %p1203_p13 = por %p1202_p12, %p1201_p11 }
 0x337   : > { %p1204_p0 = pnand %p1203_p13, %p1197_p8 }
 0x339   : > { %1207 = shalt.err (!%p1204_p0)
}
 0x33a   : > { %1134 = dma.vmem_to_hbm [thread:$0]  (%p1366_p5), %s1471_s3, 128, %s1469_s0, %s928_s22  }
 0x33b PF: > { %p1140_p1 = scmp.ge.s32.totalorder %s1242_s21, 2  ;;  %s960_s29 = sand.u32 1, %s1230_s18  }
 0x33c   : > { %s961_s30 = scalar_lea.sflag [#allocation3], %s960_s29 }
 0x33d   : > { %p1137_p2 = pnand %p1140_p1, %p1370_p6 }
 0x33f   : > { %1225 = dma.done.wait (!%p1137_p2), %s961_s30, 128  }
 0x340   : > { %1227 = vsyncadd (!%p1137_p2), %s961_s30, 4294967168  ;;  %s1550_s21 = sld [smem:[#allocation6_spill]]  ;;  %s1551_s25 = sld [smem:[#allocation5_spill]] }
 0x341   : > { %s1552_s20 = sld [smem:[#allocation7_spill]]  ;;  %s1553_s18 = smov %s1234_s19 }
 0x346   : > { %p26_p3 = scmp.ge.s32.totalorder %s1550_s21, 4   ;;  %s1554_s19 = smov %s1551_s25 }
 0x348   :  { %28 = sbr.rel (!%p26_p3) target bundleno = 9 (0x9), region = 126 }
 0x34f   :  { %973 = vsyncpa [#allocation3], 1 }
 0x350   :  { %975 = vsyncpa [#allocation3 + $0x1], 1 }

// kernel: tpu_custom_call.1
= control target key start
LH: loop header
LB: loop body
LE: loop exit
PB: predicated region body
PF: predicated region fallthrough
CT: control target
= control target key end

     0   :  { %s1513_s0 = inlined_call_operand.vmem [shape: f32[16,24], index: 0, kind: input, shape index: {}]   ;;  %s1514_s1 = inlined_call_operand.vmem [shape: f32[16,8], index: 1, kind: input, shape index: {}]   ;;  %s1515_s2 = inlined_call_operand.vmem [shape: f32[24,32], index: 2, kind: input, shape index: {}]   ;;  %s1516_s3 = inlined_call_operand.vmem [shape: f32[1,32], index: 3, kind: input, shape index: {}]   ;;  %s1517_s4 = inlined_call_operand.vmem [shape: f32[8,32], index: 4, kind: input, shape index: {}]   ;;  %s1518_s5 = inlined_call_operand.vmem [shape: f32[1,32], index: 5, kind: input, shape index: {}]   ;;  %s1519_s6 = inlined_call_operand.vmem [shape: f32[32,24], index: 6, kind: input, shape index: {}]   ;;  %s1520_s7 = inlined_call_operand.vmem [shape: f32[1,24], index: 7, kind: input, shape index: {}]   ;;  %s1521_s8 = inlined_call_operand.vmem [shape: f32[32,8], index: 8, kind: input, shape index: {}]   ;;  %s1522_s9 = inlined_call_operand.vmem [shape: f32[1,8], index: 9, kind: input, shape index: {}]   ;;  %s1523_s10 = inlined_call_operand.vmem [shape: f32[1,24], index: 10, kind: input, shape index: {}]   ;;  %s1524_s11 = inlined_call_operand.vmem [shape: f32[1,8], index: 11, kind: input, shape index: {}]   ;;  %s1525_s12 = inlined_call_operand.vmem [shape: f32[1,24], index: 12, kind: input, shape index: {}]   ;;  %s1526_s13 = inlined_call_operand.vmem [shape: f32[1,8], index: 13, kind: input, shape index: {}]   ;;  %s1527_s14 = inlined_call_operand.hbm [shape: f32[16,24], index: 14, kind: output, shape index: {0}]   ;;  %s1528_s15 = inlined_call_operand.vmem [shape: f32[16,8], index: 15, kind: output, shape index: {1}]  }
   0x1   :  { %1533 = sst [smem:[#allocation9_spill]] %s1513_s0 }
   0x2   :  { %1534 = sst [smem:[#allocation10_spill]] %s1514_s1 }
   0x3   :  { %1535 = sst [smem:[#allocation11_spill]] %s1515_s2 }
   0x4   :  { %1536 = sst [smem:[#allocation12_spill]] %s1516_s3 }
   0x5   :  { %1537 = sst [smem:[#allocation13_spill]] %s1517_s4 }
   0x6   :  { %21 = vsyncpa [#allocation3], 0 }
   0x7   :  { %23 = vsyncpa [#allocation3 + $0x1], 0  ;;  %s1328_s18 = smov 0   ;;  %s1330_s19 = smov 0  }
   0x8   :  { %s1332_s20 = smov 0   ;;  %s1334_s21 = smov 0  }
   0x9 LB: > { %1538 = sst [smem:[#allocation5_spill]] %s1238_s20  ;;  %s1349_s22 = sadd.s32 4294967295, %s1242_s21   ;;  %s1242_s21 = sphi %s1334_s21, %s1550_s21   ;;  %s1238_s20 = sphi %s1332_s20, %s1552_s20   ;;  %s1234_s19 = sphi %s1330_s19, %s1554_s19   ;;  %s1230_s18 = sphi %s1328_s18, %s1553_s18  }
   0xa   : > { %s1043_s23 = sadd.s32 4294967294, %s1242_s21   ;;  %s1353_s24 = sadd.s32 1, %s1242_s21  }
   0xb   : > { %1539 = sst [smem:[#allocation6_spill]] %s1353_s24  ;;  %s340_s25 = sadd.s32 1, %s1238_s20 }
   0xc   : > { %s337_s26 = ssub.s32 %s1242_s21, %s1353_s24  ;;  %p350_p0 = scmp.ne.s32.totalorder %s1238_s20, %s1234_s19 }
   0xd   : > { %p338_p1 = scmp.eq.s32.totalorder %s337_s26, 0  ;;  %p351_p2 = scmp.eq.s32.totalorder %s1349_s22, 1 }
   0xe   : > { %p356_p3 = scmp.ne.s32.totalorder %s1234_s19, %s1230_s18  ;;  %p357_p4 = scmp.eq.s32.totalorder %s1043_s23, 1 }
   0xf   : > { %s1364_s27 = scalar_select %p338_p1, %s1238_s20, %s340_s25  }
  0x10   : > { %p1366_p5 = por %p351_p2, %p350_p0  ;;  %p1370_p6 = por %p357_p4, %p356_p3 }
  0x11   : > { %1540 = sst [smem:[#allocation7_spill]] %s1364_s27  ;;  %p1046_p7 = scmp.ge.s32.totalorder %s1242_s21, 1 }
  0x12   : > { %s1542_s29 = scalar_select %p1370_p6, 1, 0 }
  0x13   : > { %p451_p8 = scmp.lt.s32.totalorder %s1242_s21, 3 }
  0x14   : > { %1543 = sst [smem:[#allocation8_spill]] %s1542_s29 }
  0x15   : > { %p452_p9 = pnand %p1046_p7, %p451_p8 }
  0x16   : > { %s1544_s2 = sld [smem:[#allocation11_spill]] (!%p452_p9)  ;;  %v1244_v2 = vmov (!%p452_p9), 0.0|0.0   ;;  %vm1245_vm0 = vmmov (!%p452_p9), 0   ;;  %v1246_v4 = vmov (!%p452_p9), 0.0   ;;  %p506_p10 = scmp.lt.s32.totalorder (!%p452_p9), %s1349_s22, 1  ;;  %v605_v5 = vld [vmem:[%s1519_s6] sm:$0xff] (!%p452_p9) }
  0x17   : > { %455 = sbr.rel (%p452_p9) target bundleno = 827 (0x33b), region = 76  ;;  %1119 = vmatprep.subr.bf16.mxu0 (!%p452_p9), %v1244_v2  ;;  %1089 = vmatprep.mubr.msk.f32.mxu0 (!%p452_p9), %vm1245_vm0, %v1246_v4  ;;  %v606_v6 = vld [vmem:[%s1519_s6 + $0x8] sm:$0xff] (!%p452_p9)  ;;  %vm530_vm1 = vcmask (!%p452_p9), 195584   ;;  %s1545_s0 = sld [smem:[#allocation9_spill]] (!%p452_p9)  ;;  %vm700_vm2 = vcmask (!%p452_p9), 64512   ;;  %v607_v12 = vld [vmem:[%s1519_s6 + $0x10] sm:$0xff] (!%p452_p9) }
  0x18   : > { %1122 = vmatprep.subr.bf16.mxu1 (!%p452_p9), %v1244_v2  ;;  %v1123_v7 = vpack.c.bf16 (!%p452_p9), %v606_v6, %v605_v5  ;;  %1100 = vmatprep.mubr.msk.f32.mxu1 (!%p452_p9), %vm1245_vm0, %v1246_v4  ;;  %s1546_s4 = sld [smem:[#allocation13_spill]] (!%p452_p9)  ;;  %s1547_s1 = sld [smem:[#allocation10_spill]] (!%p452_p9)  ;;  %v608_v13 = vld [vmem:[%s1519_s6 + $0x18] sm:$0xff] (!%p452_p9)  ;;  %v775_v16 = vld [vmem:[%s1521_s8] sm:$0xff] (!%p452_p9)  ;;  %v776_v17 = vld [vmem:[%s1521_s8 + $0x8] sm:$0xff] (!%p452_p9)  ;;  %vm609_vm3 = vcmask (!%p452_p9), 261120  }
  0x19   : > { %v1126_v14 = vpack.c.bf16 (!%p452_p9), %v608_v13, %v607_v12  ;;  %s1548_s3 = sld [smem:[#allocation12_spill]] (!%p452_p9)  ;;  %v1129_v21 = vpack.c.bf16 (!%p452_p9), %v776_v17, %v775_v16  ;;  %v1055_v22 = vld [vmem:[%s1518_s5] ss:$0 sm:$0xff] (!%p452_p9)  ;;  %v777_v24 = vld [vmem:[%s1521_s8 + $0x10] sm:$0xff] (!%p452_p9)  ;;  %v778_v25 = vld [vmem:[%s1521_s8 + $0x18] sm:$0xff] (!%p452_p9) }
  0x1a   : > { %1124 = vmatpush3.bf16.msra.mxu1 (!%p452_p9), %v1123_v7  ;;  %v1132_v29 = vpack.c.bf16 (!%p452_p9), %v778_v25, %v777_v24  ;;  %v1054_v32 = vld [vmem:[%s1520_s7] ss:$0 sm:$0xff] (!%p452_p9) }
  0x1b   : > { %1125 = vmatprep.subr.bf16.mxu1 (!%p452_p9), %v1244_v2  ;;  %v1058_v38 = vld [vmem:[%s1522_s9] ss:$0 sm:$0xff] (!%p452_p9) }
  0x1c   : > { %v520_v0 = vld [vmem:[%s1544_s2] sm:$0xff] (!%p452_p9)  ;;  %v521_v1 = vld [vmem:[%s1544_s2 + $0x8] sm:$0xff] (!%p452_p9)  ;;  %v522_v8 = vld [vmem:[%s1544_s2 + $0x10] sm:$0xff] (!%p452_p9) }
  0x1d   : > { %v1120_v3 = vpack.c.bf16 (!%p452_p9), %v521_v1, %v520_v0  ;;  %v1061_v0 = vld [vmem:[%s1524_s11] ss:$0 sm:$0xff] (!%p452_p9) }
  0x1e   : > { %s507_s17 = scalar_select %p506_p10, %s1349_s22, 1  ;;  %v692_v9 = vld [vmem:[%s1546_s4] sm:$0xff]  ;;  %1127 = vmatpush3.bf16.msra.mxu1 %v1126_v14 }
  0x1f   : > { %1121 = vmatpush3.bf16.msra.mxu0 %v1120_v3  ;;  %1128 = vmatprep.subr.bf16.mxu1 %v1244_v2  ;;  %v1051_v15 = vld [vmem:[%s1548_s3] ss:$0 sm:$0xff] }
  0x20   : > { %1087 = vmatprep.subr.mxu0 %v1246_v4  ;;  %s1395_s20 = sshll.u32 %s507_s17, 3  ;;  %s497_s17 = sand.u32 1, %s1234_s19   ;;  %v1059_v1 = vld [vmem:[%s1523_s10] ss:$0 sm:$0xff] }
  0x21   : > { %s509_s30 = scalar_lea.vmem %s1545_s0, %s1395_s20  ;;  %s513_s23 = scalar_lea.vmem %s1547_s1, %s1395_s20  ;;  %v1060_v5 = vld [vmem:[%s1525_s12] ss:$0 sm:$0xff] }
  0x22   : > { %v518_v10 = vld [vmem:[%s509_s30] sm:$0xff]  ;;  %s1047_s25 = sshll.u32 %s497_s17, 3  ;;  %s1064_s1 = sshll.u32 %s1349_s22, 7 }
  0x23   : > { %1088 = vmatpush3.msra.mxu0 %v522_v8  ;;  %v519_v11 = vld [vmem:[%s513_s23] sm:$0xff]  ;;  %s499_s2 = scalar_lea.vmem [#allocation2], %s1047_s25  ;;  %s517_s29 = scalar_lea.vmem %s1528_s15, %s1395_s20 }
  0x24   : > { %1090 = vmatmul.mubr.msk.f32.vlgmr.msra.gmra.mrb[0].mxu0 %vm530_vm1, %v518_v10  ;;  %1103 = vmatprep.subr.mxu0 %v1246_v4  ;;  %s945_s3 = sshll.u32 %s499_s2, 4  ;;  %s1469_s0 = scalar_lea.hbm %s1527_s14, %s1064_s1  ;;  %s1471_s3 = int_to_ptr.vmem [resolvable:$true] %s945_s3 }
  0x25   : > { %1104 = vmatpush3.msra.mxu0 %v692_v9  ;;  %1105 = vmatprep.mubr.msk.f32.mxu0 %vm1245_vm0, %v1246_v4  ;;  %s928_s22 = scalar_lea.sflag [#allocation3], %s497_s17  ;;  %s1180_s25 = scalar_lea.vmem %s1471_s3, 128 }
  0x26   : > { %p1181_p11 = scmp.ne.s32.totalorder %s1471_s3, %s1180_s25  ;;  %s1247_s20 = smov [#allocation2]  }
  0x27   : > { %s1184_s16 = sshll.u32 %s1247_s20, 4  ;;  %s1185_s16 = int_to_ptr.vmem [resolvable:$false] %s1184_s16 }
  0x28   : > { %1106 = vmatmul.mubr.msk.f32.vlgmr.msra.gmra.mrb[2].mxu0 %vm700_vm2, %v519_v11  ;;  %p1182_p12 = pnand %p1181_p11, %p1366_p5  ;;  %s1186_s1 = scalar_lea.vmem %s1185_s16, 256 }
  0x29   : > { %p1187_p0 = scmp.lt.s32.totalorder %s1471_s3, %s1185_s16  ;;  %p1188_p1 = scmp.lt.s32.totalorder %s1186_s1, %s1180_s25 }
  0x2a   : > { %p1183_p13 = pneg %p1182_p12 }
  0x2b   : > { %p1189_p2 = por %p1188_p1, %p1187_p0 }
  0x2d   : > { %p1190_p3 = pnand %p1189_p2, %p1183_p13 }
  0xf7   : > { %v600_v18 = vpop.f32.mrb[0].mxu0 }
  0xf8   : > { %v601_v19 = vadd.f32 %v1051_v15, %v600_v18  ;;  %v1091_v20 = vpop.f32.mrb[1].mxu0 }
  0xfa   : > { %v604_v23 = vmax.f32 %v601_v19, 0.0 }
  0xfb   : > { %v770_v26 = vpop.f32.mrb[2].mxu0 }
  0xfc   : > { %1101 = vmatmul.mubr.msk.f32.vlgmr.msra.gmra.mrb[0].mxu1 %vm609_vm3, %v604_v23  ;;  %v771_v27 = vadd.f32 %v1055_v22, %v770_v26  ;;  %v1107_v28 = vpop.f32.mrb[3].mxu0 }
  0xfd   : > { %1130 = vmatpush3.bf16.msra.mxu1 %v1129_v21  ;;  %1116 = vmatprep.mubr.msk.f32.mxu1 %vm1245_vm0, %v1246_v4  ;;  %v1062_v4 = vld [vmem:[%s1526_s13] ss:$0 sm:$0xff] }
  0xfe   : > { %1131 = vmatprep.subr.bf16.mxu1 %v1244_v2  ;;  %v774_v30 = vmax.f32 %v771_v27, 0.0 }
 0x101   : > { %1133 = vmatpush3.bf16.msra.mxu1 %v1132_v29 }
 0x104   : > { %1117 = vmatmul.mubr.msk.f32.vlgmr.msra.gmra.mrb[2].mxu1 %vm609_vm3, %v774_v30 }
 0x1cf   : > { %v679_v31 = vpop.f32.mrb[0].mxu1 }
 0x1d0   : > { %v683_v33 = vadd.f32 %v679_v31, %v518_v10  ;;  %v1102_v34 = vpop.f32.mrb[1].mxu1 }
 0x1d2   : > { %v691_v35 = vadd.f32 %v1054_v32, %v683_v33 }
 0x1d4   : > { %v861_v36 = vsel %vm530_vm1, %v691_v35, 0.0 }
 0x1d5   : > { %862 = vadd.xlane.f32.xlu0 %v861_v36 }
 0x1d7   : > { %v848_v37 = vpop.f32.mrb[2].mxu1 }
 0x1d8   : > { %v852_v39 = vadd.f32 %v848_v37, %v519_v11  ;;  %v1118_v40 = vpop.f32.mrb[3].mxu1 }
 0x1da   : > { %v860_v41 = vadd.f32 %v1058_v38, %v852_v39 }
 0x1dc   : > { %v864_v42 = vsel %vm700_vm2, %v860_v41, 0.0 }
 0x1dd   : > { %865 = vadd.xlane.f32.xlu0 %v864_v42 }
 0x262   : > { %v863_v43 = vpop.xlane.xlu0 %862 }
 0x26a   : > { %v866_v44 = vpop.xlane.xlu0 %865 }
 0x26b   : > { %v867_v45 = vadd.f32 %v866_v44, %v863_v43 }
 0x26d   : > { %v868_v46 = vmul.f32 0.03125, %v867_v45 }
 0x26f   : > { %v869_v47 = vsub.f32 %v691_v35, %v868_v46  ;;  %v870_v48 = vsub.f32 %v860_v41, %v868_v46 }
 0x271   : > { %v871_v49 = vmul.f32 %v869_v47, %v869_v47  ;;  %v875_v51 = vmul.f32 %v870_v48, %v870_v48 }
 0x273   : > { %v872_v50 = vsel %vm530_vm1, %v871_v49, 0.0  ;;  %v876_v52 = vsel %vm700_vm2, %v875_v51, 0.0 }
 0x274   : > { %873 = vadd.xlane.f32.xlu1 %v872_v50 }
 0x278   : > { %877 = vadd.xlane.f32.xlu1 %v876_v52 }
 0x301   : > { %v874_v53 = vpop.xlane.xlu1 %873 }
 0x305   : > { %v878_v54 = vpop.xlane.xlu1 %877 }
 0x306   : > { %v879_v55 = vadd.f32 %v878_v54, %v874_v53 }
 0x308   : > { %v880_v56 = vmul.f32 0.032258064, %v879_v55 }
 0x30a   : > { %1176 = vrsqrt.f32 %v880_v56  ;;  %vm883_vm4 = vcmp.eq.f32.partialorder %v880_v56, inf  ;;  %v886_v59 = vand.u32 2147483648, %v880_v56  ;;  %vm885_vm5 = vcmp.eq.f32.partialorder %v880_v56, 0.0 }
 0x314   : > { %v1177_v57 = vpop.eup %1176 }
 0x315   : > { %v882_v58 = vmul.f32 %v1177_v57, %v880_v56 }
 0x317   : > { %v884_v60 = vsel %vm883_vm4, %v880_v56, %v882_v58 }
 0x318   : > { %v887_v61 = vsel %vm885_vm5, %v886_v59, %v884_v60 }
 0x319   : > { %v888_v62 = vadd.f32 0.001, %v887_v61 }
 0x31b   : > { %1178 = vrcp.f32 %v888_v62 }
 0x325   : > { %v1179_v63 = vpop.eup %1178 }
 0x326   : > { %v909_v2 = vmul.f32 %v1179_v63, %v870_v48  ;;  %v891_v3 = vmul.f32 %v1179_v63, %v869_v47 }
 0x328   : > { %v917_v6 = vmul.f32 %v1061_v0, %v909_v2  ;;  %v899_v7 = vmul.f32 %v1059_v1, %v891_v3 }
 0x32a   : > { %v925_v8 = vadd.f32 %v1062_v4, %v917_v6  ;;  %v907_v9 = vadd.f32 %v1060_v5, %v899_v7 }
 0x32c   : > { %926 = vst.msk [vmem:[%s517_s29] sm:$0xff] %vm700_vm2, %v925_v8 }
 0x32d   : > { %908 = vst.msk [vmem:[%s499_s2] sm:$0xff] %vm530_vm1, %v907_v9 }
 0x32e   : > { %1193 = shalt.err (!%p1190_p3)
}
 0x32f   : > { %s1194_s2 = scalar_lea.hbm %s1469_s0, 128  ;;  %s1198_s27 = scalar_lea.hbm %s1527_s14, 256 }
 0x330   : > { %p1195_p4 = scmp.ne.s32.totalorder %s1469_s0, %s1194_s2  ;;  %p1199_p9 = scmp.lt.u32.totalorder %s1469_s0, %s1527_s14 }
 0x331   : > { %p1200_p10 = scmp.lt.u32.totalorder %s1198_s27, %s1194_s2  ;;  %p1202_p12 = scmp.lt.u32.totalorder %s1194_s2, %s1469_s0 }
 0x332   : > { %p1196_p7 = pnand %p1195_p4, %p1366_p5 }
 0x333   : > { %p1201_p11 = por %p1200_p10, %p1199_p9 }
 0x334   : > { %p1197_p8 = pneg %p1196_p7 }
 0x335   : > { %p1203_p13 = por %p1202_p12, %p1201_p11 }
 0x337   : > { %p1204_p0 = pnand %p1203_p13, %p1197_p8 }
 0x339   : > { %1207 = shalt.err (!%p1204_p0)
}
 0x33a   : > { %1134 = dma.vmem_to_hbm [thread:$0]  (%p1366_p5), %s1471_s3, 128, %s1469_s0, %s928_s22  }
 0x33b PF: > { %p1140_p1 = scmp.ge.s32.totalorder %s1242_s21, 2  ;;  %s960_s29 = sand.u32 1, %s1230_s18  }
 0x33c   : > { %s961_s30 = scalar_lea.sflag [#allocation3], %s960_s29 }
 0x33d   : > { %p1137_p2 = pnand %p1140_p1, %p1370_p6 }
 0x33f   : > { %1225 = dma.done.wait (!%p1137_p2), %s961_s30, 128  }
 0x340   : > { %1227 = vsyncadd (!%p1137_p2), %s961_s30, 4294967168  ;;  %s1550_s21 = sld [smem:[#allocation6_spill]]  ;;  %s1551_s25 = sld [smem:[#allocation5_spill]] }
 0x341   : > { %s1552_s20 = sld [smem:[#allocation7_spill]]  ;;  %s1553_s18 = smov %s1234_s19 }
 0x346   : > { %p26_p3 = scmp.ge.s32.totalorder %s1550_s21, 4   ;;  %s1554_s19 = smov %s1551_s25 }
 0x348   :  { %28 = sbr.rel (!%p26_p3) target bundleno = 9 (0x9), region = 126 }
 0x34f   :  { %973 = vsyncpa [#allocation3], 1 }
 0x350   :  { %975 = vsyncpa [#allocation3 + $0x1], 1 }

</bundles_post_ra>
